<compile_context>
chip_gen: v5e
topology: v5e:2x2
jax: 0.10.0
libtpu: 0.0.40
codegen_flags: <defaults>
</compile_context>

<pallas_src>
import math

import jax
import jax.numpy as jnp
from jax.experimental import pallas as pl
from jax.experimental.pallas import tpu as pltpu


def set_default(_look, _dict, _default):
    return _dict[_look] if _look in _dict else _default


def _cdiv(a, b):
    return -(-a // b)


def _round_up(x, m):
    return _cdiv(x, m) * m


def _sublane_pack(dtype):
    # Sublane packing of the second-minor dim: f32 -> 8, bf16 -> 16, int8 -> 32.
    itemsize = jnp.dtype(dtype).itemsize
    return max(8, 32 // max(1, itemsize))


_TARGET_CHUNKS = 4               # concurrent DMAs per input on the fast path
_MIN_SEGMENT_BYTES = 512         # below this, strided HBM->HBM DMA is inefficient
_VMEM_BLOCK_BUDGET = 4 * 1024 * 1024  # per-step block bytes (x2 double buffering)


# --------------------------------------------------------------------------
# Fast path: direct, chunked HBM->HBM DMAs.
# --------------------------------------------------------------------------
def _make_hbm_cat_kernel(num_inputs, plan):
    """plan[i] = list of chunks; each chunk = (src_spec, dst_spec) where a spec
    is a (rows, cols) pair and each entry is either None (full extent) or a
    static (start, size) tuple."""

    def _ix(spec):
        return tuple(slice(None) if s is None else pl.ds(s[0], s[1]) for s in spec)

    def kernel(*refs):
        in_refs = refs[:num_inputs]
        out_ref = refs[num_inputs]
        sems = refs[num_inputs + 1]

        copies = []
        # Start every chunk DMA first so they overlap across DMA queues ...
        for i, chunks in enumerate(plan):
            for c, (src_spec, dst_spec) in enumerate(chunks):
                cp = pltpu.make_async_copy(
                    in_refs[i].at[_ix(src_spec)],
                    out_ref.at[_ix(dst_spec)],
                    sems.at[i, c],
                )
                cp.start()
                copies.append(cp)
        # ... then wait for all of them.
        for cp in copies:
            cp.wait()

    return kernel


def _build_dma_plan(lead, widths, col_offsets, pack):
    """Split each input's copy into several DMAs along a non-concat direction.

    Chunk boundaries stay sublane-aligned (rows) / 128-lane-aligned (cols) so
    that no two in-flight DMAs ever do a partial write on the same output tile.
    """
    plan = []
    for w, c0 in zip(widths, col_offsets):
        chunks = []
        if lead >= 2 * pack:
            # Chunk along the shared (non-concat) leading dim.
            n = min(_TARGET_CHUNKS, lead // pack)
            rows_per = _round_up(_cdiv(lead, n), pack)
            r = 0
            while r < lead:
                nr = min(rows_per, lead - r)
                chunks.append((((r, nr), None), ((r, nr), (c0, w))))
                r += nr
        elif w >= 2 * 128:
            # Too few rows to split: chunk along 128-lane-aligned column groups.
            n = min(_TARGET_CHUNKS, w // 128)
            cols_per = _round_up(_cdiv(w, n), 128)
            c = 0
            while c < w:
                nc = min(cols_per, w - c)
                chunks.append(((None, (c, nc)), (None, (c0 + c, nc))))
                c += nc
        else:
            chunks.append(((None, None), (None, (c0, w))))
        plan.append(chunks)
    return plan


# --------------------------------------------------------------------------
# Fallback path: stage row blocks through VMEM, write lane-dense output blocks.
# --------------------------------------------------------------------------
def _make_vmem_cat_kernel(num_inputs, widths):
    def kernel(*refs):
        in_refs = refs[:num_inputs]
        out_ref = refs[num_inputs]
        col = 0
        for i in range(num_inputs):
            out_ref[:, col:col + widths[i]] = in_refs[i][...]
            col += widths[i]

    return kernel


# --------------------------------------------------------------------------
# Wrapper
# --------------------------------------------------------------------------
def cat_streams_pallas(inputs, cat_dim):
    """Pallas equivalent of `torch.cat(inputs, dim=cat_dim)`."""
    num_inputs = len(inputs)
    assert num_inputs >= 1, "cat_streams_pallas needs at least one input"
    x0 = inputs[0]
    ndim = x0.ndim
    cat_dim = cat_dim % ndim  # normalize negative dims
    dtype = x0.dtype
    itemsize = jnp.dtype(dtype).itemsize

    # Validate dtype / non-cat-dim shapes (a mismatch would otherwise produce
    # wrong slices or an opaque lowering error).
    for k, x in enumerate(inputs):
        assert x.dtype == dtype, f"input {k}: dtype {x.dtype} != {dtype}"
        assert x.ndim == ndim, f"input {k}: rank {x.ndim} != {ndim}"
        for d in range(ndim):
            if d != cat_dim:
                assert x.shape[d] == x0.shape[d], (
                    f"input {k}: dim {d} is {x.shape[d]}, expected {x0.shape[d]}")

    sizes = [int(x.shape[cat_dim]) for x in inputs]
    out_shape_full = list(x0.shape)
    out_shape_full[cat_dim] = sum(sizes)
    out_shape_full = tuple(out_shape_full)

    # Drop zero-width inputs (they contribute nothing to the output).
    if any(s == 0 for s in sizes):
        keep = [x for x in inputs if int(x.shape[cat_dim]) > 0]
        if not keep:
            return jnp.zeros(out_shape_full, dtype)
        if len(keep) == 1:
            return jnp.reshape(keep[0], out_shape_full)
        return cat_streams_pallas(keep, cat_dim)
    if num_inputs == 1:
        return x0

    # Collapse to 2D: dims before cat_dim -> one leading dim; cat_dim plus all
    # trailing dims -> one contiguous column extent per input.
    lead = math.prod(x0.shape[:cat_dim]) if cat_dim > 0 else 1
    trail = math.prod(x0.shape[cat_dim + 1:]) if cat_dim < ndim - 1 else 1
    widths = [s * trail for s in sizes]
    total_width = sum(widths)
    col_offsets = [0]
    for w in widths[:-1]:
        col_offsets.append(col_offsets[-1] + w)

    views = [jnp.reshape(x, (lead, w)) for x, w in zip(inputs, widths)]
    out2d_shape = (lead, total_width)
    pack = _sublane_pack(dtype)

    boundaries_aligned = all(off % 128 == 0 for off in col_offsets)
    segments_big = min(widths) * itemsize >= _MIN_SEGMENT_BYTES

    if boundaries_aligned and segments_big:
        # ---- Fast path: direct, chunked HBM->HBM DMAs. ----
        plan = _build_dma_plan(lead, widths, col_offsets, pack)
        max_chunks = max(len(c) for c in plan)
        kernel = _make_hbm_cat_kernel(num_inputs, plan)
        # TODO(synk): for >8 input streams on v7x, split DMA issuance across the
        # two TensorCores (pl.core_map / parallel leading grid dim).
        out2d = pl.pallas_call(
            kernel,
            out_shape=jax.ShapeDtypeStruct(out2d_shape, dtype),
            in_specs=[pl.BlockSpec(memory_space=pl.ANY)] * num_inputs,
            out_specs=pl.BlockSpec(memory_space=pl.ANY),
            scratch_shapes=[pltpu.SemaphoreType.DMA((num_inputs, max_chunks))],
            compiler_params=pltpu.CompilerParams(has_side_effects=True),
        )(*views)
    else:
        # ---- Fallback: stage row blocks through VMEM, lane-dense output. ----
        row_bytes = 2 * total_width * itemsize  # inputs + output per row
        tl = max(1, _VMEM_BLOCK_BUDGET // max(1, row_bytes))
        if tl >= lead:
            tl = lead  # single block covers all rows
        else:
            tl = max(pack, (tl // pack) * pack)  # sublane-aligned row blocks
            if tl > lead:
                tl = lead
        # TODO(synk): if lead is tiny but rows are enormous, also tile columns to
        # bound VMEM; not needed for the shapes this module is used with.
        grid = (_cdiv(lead, tl),)
        kernel = _make_vmem_cat_kernel(num_inputs, widths)
        out2d = pl.pallas_call(
            kernel,
            out_shape=jax.ShapeDtypeStruct(out2d_shape, dtype),
            grid=grid,
            in_specs=[pl.BlockSpec((tl, w), lambda l: (l, 0)) for w in widths],
            out_specs=pl.BlockSpec((tl, total_width), lambda l: (l, 0)),
            compiler_params=pltpu.CompilerParams(
                dimension_semantics=("parallel",),
                vmem_limit_bytes=32 * 1024 * 1024,
            ),
        )(*views)

    return jnp.reshape(out2d, out_shape_full)


class CatStreams:
    """JAX/Pallas port of the PyTorch CatStreams module."""

    def __init__(self, config, _streams):
        self.output_name = set_default("output_name", config, "x")
        assert "input_list" in config, "Cat_streams must be given 'input_list'!"
        assert "cat_dim" in config, "Cat_streams must be given 'cat_dim'"
        self.input_list = config["input_list"]
        self.cat_dim = config["cat_dim"]
        # When the concat feeds an ordinary XLA consumer, jnp.concatenate can be
        # fused into producers/consumers (eliminating the copy entirely); flip
        # this to False to bypass the Pallas boundary in those cases.
        self.use_pallas = set_default("use_pallas", config, True)

        input_streams = []
        cat_dim_out = 0
        for input_name in self.input_list:
            input_shape = _streams[input_name]
            input_streams.append([input_name, input_shape])
            cat_dim_out += input_shape[self.cat_dim]
        self.output_shape = list(input_streams[0][1]).copy()
        self.output_shape[self.cat_dim] = cat_dim_out
        self.streams_in_module = {
            "inputs": input_streams,
            "outputs": [[self.output_name, self.output_shape]],
        }

    def __call__(self, _data):
        xs = [_data[name] for name in self.input_list]
        if self.use_pallas:
            _data[self.output_name] = cat_streams_pallas(xs, self.cat_dim)
        else:
            _data[self.output_name] = jnp.concatenate(xs, axis=self.cat_dim)
        return _data


if __name__ == "__main__":
    key = jax.random.PRNGKey(0)
    k1, k2, k3, k4, k5, k6, k7, k8 = jax.random.split(key, 8)

    # --- Test 1: module API, NCHW channel concat (fast HBM-DMA path). ---
    x1 = jax.random.normal(k1, (2, 4, 16, 16), dtype=jnp.float32)
    x2 = jax.random.normal(k2, (2, 8, 16, 16), dtype=jnp.float32)
    config = {"output_name": "y", "input_list": ["x1", "x2"], "cat_dim": 1}
    streams = {"x1": list(x1.shape), "x2": list(x2.shape)}
    module = CatStreams(config, streams)
    data = module({"x1": x1, "x2": x2})
    y = jax.block_until_ready(data["y"])
    ref = jnp.concatenate([x1, x2], axis=1)
    assert y.shape == tuple(module.output_shape), (y.shape, module.output_shape)
    assert y.dtype == x1.dtype
    assert bool(jnp.all(y == ref))

    # --- Test 2: narrow, misaligned last-dim concat (VMEM fallback path). ---
    a = jax.random.normal(k3, (4, 8, 12), dtype=jnp.float32)
    b = jax.random.normal(k4, (4, 8, 20), dtype=jnp.float32)
    y2 = jax.block_until_ready(cat_streams_pallas([a, b], -1))
    assert bool(jnp.all(y2 == jnp.concatenate([a, b], axis=-1)))

    # --- Test 3: cat_dim=0, aligned (fast path, column-chunked DMAs). ---
    c = jax.random.normal(k5, (8, 128), dtype=jnp.float32)
    d = jax.random.normal(k6, (16, 128), dtype=jnp.float32)
    y3 = jax.block_until_ready(cat_streams_pallas([c, d], 0))
    assert bool(jnp.all(y3 == jnp.concatenate([c, d], axis=0)))

    # --- Test 4: last-dim concat, 128-aligned (fast path, row-chunked DMAs). ---
    e = jax.random.normal(k7, (64, 256), dtype=jnp.float32)
    f = jax.random.normal(k8, (64, 128), dtype=jnp.float32)
    y4 = jax.block_until_ready(cat_streams_pallas([e, f], 1))
    assert bool(jnp.all(y4 == jnp.concatenate([e, f], axis=1)))

    print("KERNEL_OK")
</pallas_src>

<mosaic_0001>
module attributes {stable_mosaic.version = 11 : i64} {
  func.func @kernel(%arg0: memref<2x1024xf32, #tpu.memory_space<any>>, %arg1: memref<2x2048xf32, #tpu.memory_space<any>>, %arg2: memref<2x3072xf32, #tpu.memory_space<any>>, %arg3: memref<2x4x!tpu.dma_semaphore, #tpu.memory_space<semaphore_mem>>) attributes {dimension_semantics = [], scalar_prefetch = 0 : i64, scratch_operands = 1 : i64, tpu.core_type = #tpu.core_type<tc>} {
    %c0_i32 = arith.constant 0 : i32
    %c0_i32_0 = arith.constant 0 : i32
    %c0_i32_1 = arith.constant 0 : i32
    %c0_i32_2 = arith.constant 0 : i32
    %0 = tpu.memref_slice %arg0[%c0_i32_1, %c0_i32_2] : memref<2x1024xf32, #tpu.memory_space<any>> -> memref<2x256xf32, #tpu.memory_space<any>>
    %c0_i32_3 = arith.constant 0 : i32
    %c0_i32_4 = arith.constant 0 : i32
    %1 = tpu.memref_slice %arg2[%c0_i32_3, %c0_i32_4] : memref<2x3072xf32, #tpu.memory_space<any>> -> memref<2x256xf32, #tpu.memory_space<any>>
    %2 = tpu.memref_slice %arg3[%c0_i32, %c0_i32_0] : memref<2x4x!tpu.dma_semaphore, #tpu.memory_space<semaphore_mem>> -> memref<1x1x!tpu.dma_semaphore, #tpu.memory_space<semaphore_mem>>
    %3 = tpu.memref_squeeze %2 : memref<1x1x!tpu.dma_semaphore, #tpu.memory_space<semaphore_mem>> -> memref<!tpu.dma_semaphore, #tpu.memory_space<semaphore_mem>>
    tpu.enqueue_dma source(%0 : memref<2x256xf32, #tpu.memory_space<any>>) target(%1 : memref<2x256xf32, #tpu.memory_space<any>>) target_semaphore(%3 : memref<!tpu.dma_semaphore, #tpu.memory_space<semaphore_mem>>)
    %c0_i32_5 = arith.constant 0 : i32
    %c1_i32 = arith.constant 1 : i32
    %c0_i32_6 = arith.constant 0 : i32
    %c256_i32 = arith.constant 256 : i32
    %4 = tpu.memref_slice %arg0[%c0_i32_6, %c256_i32] : memref<2x1024xf32, #tpu.memory_space<any>> -> memref<2x256xf32, #tpu.memory_space<any>>
    %c0_i32_7 = arith.constant 0 : i32
    %c256_i32_8 = arith.constant 256 : i32
    %5 = tpu.memref_slice %arg2[%c0_i32_7, %c256_i32_8] : memref<2x3072xf32, #tpu.memory_space<any>> -> memref<2x256xf32, #tpu.memory_space<any>>
    %6 = tpu.memref_slice %arg3[%c0_i32_5, %c1_i32] : memref<2x4x!tpu.dma_semaphore, #tpu.memory_space<semaphore_mem>> -> memref<1x1x!tpu.dma_semaphore, #tpu.memory_space<semaphore_mem>>
    %7 = tpu.memref_squeeze %6 : memref<1x1x!tpu.dma_semaphore, #tpu.memory_space<semaphore_mem>> -> memref<!tpu.dma_semaphore, #tpu.memory_space<semaphore_mem>>
    tpu.enqueue_dma source(%4 : memref<2x256xf32, #tpu.memory_space<any>>) target(%5 : memref<2x256xf32, #tpu.memory_space<any>>) target_semaphore(%7 : memref<!tpu.dma_semaphore, #tpu.memory_space<semaphore_mem>>)
    %c0_i32_9 = arith.constant 0 : i32
    %c2_i32 = arith.constant 2 : i32
    %c0_i32_10 = arith.constant 0 : i32
    %c512_i32 = arith.constant 512 : i32
    %8 = tpu.memref_slice %arg0[%c0_i32_10, %c512_i32] : memref<2x1024xf32, #tpu.memory_space<any>> -> memref<2x256xf32, #tpu.memory_space<any>>
    %c0_i32_11 = arith.constant 0 : i32
    %c512_i32_12 = arith.constant 512 : i32
    %9 = tpu.memref_slice %arg2[%c0_i32_11, %c512_i32_12] : memref<2x3072xf32, #tpu.memory_space<any>> -> memref<2x256xf32, #tpu.memory_space<any>>
    %10 = tpu.memref_slice %arg3[%c0_i32_9, %c2_i32] : memref<2x4x!tpu.dma_semaphore, #tpu.memory_space<semaphore_mem>> -> memref<1x1x!tpu.dma_semaphore, #tpu.memory_space<semaphore_mem>>
    %11 = tpu.memref_squeeze %10 : memref<1x1x!tpu.dma_semaphore, #tpu.memory_space<semaphore_mem>> -> memref<!tpu.dma_semaphore, #tpu.memory_space<semaphore_mem>>
    tpu.enqueue_dma source(%8 : memref<2x256xf32, #tpu.memory_space<any>>) target(%9 : memref<2x256xf32, #tpu.memory_space<any>>) target_semaphore(%11 : memref<!tpu.dma_semaphore, #tpu.memory_space<semaphore_mem>>)
    %c0_i32_13 = arith.constant 0 : i32
    %c3_i32 = arith.constant 3 : i32
    %c0_i32_14 = arith.constant 0 : i32
    %c768_i32 = arith.constant 768 : i32
    %12 = tpu.memref_slice %arg0[%c0_i32_14, %c768_i32] : memref<2x1024xf32, #tpu.memory_space<any>> -> memref<2x256xf32, #tpu.memory_space<any>>
    %c0_i32_15 = arith.constant 0 : i32
    %c768_i32_16 = arith.constant 768 : i32
    %13 = tpu.memref_slice %arg2[%c0_i32_15, %c768_i32_16] : memref<2x3072xf32, #tpu.memory_space<any>> -> memref<2x256xf32, #tpu.memory_space<any>>
    %14 = tpu.memref_slice %arg3[%c0_i32_13, %c3_i32] : memref<2x4x!tpu.dma_semaphore, #tpu.memory_space<semaphore_mem>> -> memref<1x1x!tpu.dma_semaphore, #tpu.memory_space<semaphore_mem>>
    %15 = tpu.memref_squeeze %14 : memref<1x1x!tpu.dma_semaphore, #tpu.memory_space<semaphore_mem>> -> memref<!tpu.dma_semaphore, #tpu.memory_space<semaphore_mem>>
    tpu.enqueue_dma source(%12 : memref<2x256xf32, #tpu.memory_space<any>>) target(%13 : memref<2x256xf32, #tpu.memory_space<any>>) target_semaphore(%15 : memref<!tpu.dma_semaphore, #tpu.memory_space<semaphore_mem>>)
    %c1_i32_17 = arith.constant 1 : i32
    %c0_i32_18 = arith.constant 0 : i32
    %c0_i32_19 = arith.constant 0 : i32
    %c0_i32_20 = arith.constant 0 : i32
    %16 = tpu.memref_slice %arg1[%c0_i32_19, %c0_i32_20] : memref<2x2048xf32, #tpu.memory_space<any>> -> memref<2x512xf32, #tpu.memory_space<any>>
    %c0_i32_21 = arith.constant 0 : i32
    %c1024_i32 = arith.constant 1024 : i32
    %17 = tpu.memref_slice %arg2[%c0_i32_21, %c1024_i32] : memref<2x3072xf32, #tpu.memory_space<any>> -> memref<2x512xf32, #tpu.memory_space<any>>
    %18 = tpu.memref_slice %arg3[%c1_i32_17, %c0_i32_18] : memref<2x4x!tpu.dma_semaphore, #tpu.memory_space<semaphore_mem>> -> memref<1x1x!tpu.dma_semaphore, #tpu.memory_space<semaphore_mem>>
    %19 = tpu.memref_squeeze %18 : memref<1x1x!tpu.dma_semaphore, #tpu.memory_space<semaphore_mem>> -> memref<!tpu.dma_semaphore, #tpu.memory_space<semaphore_mem>>
    tpu.enqueue_dma source(%16 : memref<2x512xf32, #tpu.memory_space<any>>) target(%17 : memref<2x512xf32, #tpu.memory_space<any>>) target_semaphore(%19 : memref<!tpu.dma_semaphore, #tpu.memory_space<semaphore_mem>>)
    %c1_i32_22 = arith.constant 1 : i32
    %c1_i32_23 = arith.constant 1 : i32
    %c0_i32_24 = arith.constant 0 : i32
    %c512_i32_25 = arith.constant 512 : i32
    %20 = tpu.memref_slice %arg1[%c0_i32_24, %c512_i32_25] : memref<2x2048xf32, #tpu.memory_space<any>> -> memref<2x512xf32, #tpu.memory_space<any>>
    %c0_i32_26 = arith.constant 0 : i32
    %c1536_i32 = arith.constant 1536 : i32
    %21 = tpu.memref_slice %arg2[%c0_i32_26, %c1536_i32] : memref<2x3072xf32, #tpu.memory_space<any>> -> memref<2x512xf32, #tpu.memory_space<any>>
    %22 = tpu.memref_slice %arg3[%c1_i32_22, %c1_i32_23] : memref<2x4x!tpu.dma_semaphore, #tpu.memory_space<semaphore_mem>> -> memref<1x1x!tpu.dma_semaphore, #tpu.memory_space<semaphore_mem>>
    %23 = tpu.memref_squeeze %22 : memref<1x1x!tpu.dma_semaphore, #tpu.memory_space<semaphore_mem>> -> memref<!tpu.dma_semaphore, #tpu.memory_space<semaphore_mem>>
    tpu.enqueue_dma source(%20 : memref<2x512xf32, #tpu.memory_space<any>>) target(%21 : memref<2x512xf32, #tpu.memory_space<any>>) target_semaphore(%23 : memref<!tpu.dma_semaphore, #tpu.memory_space<semaphore_mem>>)
    %c1_i32_27 = arith.constant 1 : i32
    %c2_i32_28 = arith.constant 2 : i32
    %c0_i32_29 = arith.constant 0 : i32
    %c1024_i32_30 = arith.constant 1024 : i32
    %24 = tpu.memref_slice %arg1[%c0_i32_29, %c1024_i32_30] : memref<2x2048xf32, #tpu.memory_space<any>> -> memref<2x512xf32, #tpu.memory_space<any>>
    %c0_i32_31 = arith.constant 0 : i32
    %c2048_i32 = arith.constant 2048 : i32
    %25 = tpu.memref_slice %arg2[%c0_i32_31, %c2048_i32] : memref<2x3072xf32, #tpu.memory_space<any>> -> memref<2x512xf32, #tpu.memory_space<any>>
    %26 = tpu.memref_slice %arg3[%c1_i32_27, %c2_i32_28] : memref<2x4x!tpu.dma_semaphore, #tpu.memory_space<semaphore_mem>> -> memref<1x1x!tpu.dma_semaphore, #tpu.memory_space<semaphore_mem>>
    %27 = tpu.memref_squeeze %26 : memref<1x1x!tpu.dma_semaphore, #tpu.memory_space<semaphore_mem>> -> memref<!tpu.dma_semaphore, #tpu.memory_space<semaphore_mem>>
    tpu.enqueue_dma source(%24 : memref<2x512xf32, #tpu.memory_space<any>>) target(%25 : memref<2x512xf32, #tpu.memory_space<any>>) target_semaphore(%27 : memref<!tpu.dma_semaphore, #tpu.memory_space<semaphore_mem>>)
    %c1_i32_32 = arith.constant 1 : i32
    %c3_i32_33 = arith.constant 3 : i32
    %c0_i32_34 = arith.constant 0 : i32
    %c1536_i32_35 = arith.constant 1536 : i32
    %28 = tpu.memref_slice %arg1[%c0_i32_34, %c1536_i32_35] : memref<2x2048xf32, #tpu.memory_space<any>> -> memref<2x512xf32, #tpu.memory_space<any>>
    %c0_i32_36 = arith.constant 0 : i32
    %c2560_i32 = arith.constant 2560 : i32
    %29 = tpu.memref_slice %arg2[%c0_i32_36, %c2560_i32] : memref<2x3072xf32, #tpu.memory_space<any>> -> memref<2x512xf32, #tpu.memory_space<any>>
    %30 = tpu.memref_slice %arg3[%c1_i32_32, %c3_i32_33] : memref<2x4x!tpu.dma_semaphore, #tpu.memory_space<semaphore_mem>> -> memref<1x1x!tpu.dma_semaphore, #tpu.memory_space<semaphore_mem>>
    %31 = tpu.memref_squeeze %30 : memref<1x1x!tpu.dma_semaphore, #tpu.memory_space<semaphore_mem>> -> memref<!tpu.dma_semaphore, #tpu.memory_space<semaphore_mem>>
    tpu.enqueue_dma source(%28 : memref<2x512xf32, #tpu.memory_space<any>>) target(%29 : memref<2x512xf32, #tpu.memory_space<any>>) target_semaphore(%31 : memref<!tpu.dma_semaphore, #tpu.memory_space<semaphore_mem>>)
    %c0_i32_37 = arith.constant 0 : i32
    %c0_i32_38 = arith.constant 0 : i32
    %c0_i32_39 = arith.constant 0 : i32
    %c0_i32_40 = arith.constant 0 : i32
    %32 = tpu.memref_slice %arg0[%c0_i32_39, %c0_i32_40] : memref<2x1024xf32, #tpu.memory_space<any>> -> memref<2x256xf32, #tpu.memory_space<any>>
    %c0_i32_41 = arith.constant 0 : i32
    %c0_i32_42 = arith.constant 0 : i32
    %33 = tpu.memref_slice %arg2[%c0_i32_41, %c0_i32_42] : memref<2x3072xf32, #tpu.memory_space<any>> -> memref<2x256xf32, #tpu.memory_space<any>>
    %34 = tpu.memref_slice %arg3[%c0_i32_37, %c0_i32_38] : memref<2x4x!tpu.dma_semaphore, #tpu.memory_space<semaphore_mem>> -> memref<1x1x!tpu.dma_semaphore, #tpu.memory_space<semaphore_mem>>
    %35 = tpu.memref_squeeze %34 : memref<1x1x!tpu.dma_semaphore, #tpu.memory_space<semaphore_mem>> -> memref<!tpu.dma_semaphore, #tpu.memory_space<semaphore_mem>>
    tpu.wait_dma2 semaphore(%35 : memref<!tpu.dma_semaphore, #tpu.memory_space<semaphore_mem>>) src(%32 : memref<2x256xf32, #tpu.memory_space<any>>) dst(%33 : memref<2x256xf32, #tpu.memory_space<any>>)
    %c0_i32_43 = arith.constant 0 : i32
    %c1_i32_44 = arith.constant 1 : i32
    %c0_i32_45 = arith.constant 0 : i32
    %c256_i32_46 = arith.constant 256 : i32
    %36 = tpu.memref_slice %arg0[%c0_i32_45, %c256_i32_46] : memref<2x1024xf32, #tpu.memory_space<any>> -> memref<2x256xf32, #tpu.memory_space<any>>
    %c0_i32_47 = arith.constant 0 : i32
    %c256_i32_48 = arith.constant 256 : i32
    %37 = tpu.memref_slice %arg2[%c0_i32_47, %c256_i32_48] : memref<2x3072xf32, #tpu.memory_space<any>> -> memref<2x256xf32, #tpu.memory_space<any>>
    %38 = tpu.memref_slice %arg3[%c0_i32_43, %c1_i32_44] : memref<2x4x!tpu.dma_semaphore, #tpu.memory_space<semaphore_mem>> -> memref<1x1x!tpu.dma_semaphore, #tpu.memory_space<semaphore_mem>>
    %39 = tpu.memref_squeeze %38 : memref<1x1x!tpu.dma_semaphore, #tpu.memory_space<semaphore_mem>> -> memref<!tpu.dma_semaphore, #tpu.memory_space<semaphore_mem>>
    tpu.wait_dma2 semaphore(%39 : memref<!tpu.dma_semaphore, #tpu.memory_space<semaphore_mem>>) src(%36 : memref<2x256xf32, #tpu.memory_space<any>>) dst(%37 : memref<2x256xf32, #tpu.memory_space<any>>)
    %c0_i32_49 = arith.constant 0 : i32
    %c2_i32_50 = arith.constant 2 : i32
    %c0_i32_51 = arith.constant 0 : i32
    %c512_i32_52 = arith.constant 512 : i32
    %40 = tpu.memref_slice %arg0[%c0_i32_51, %c512_i32_52] : memref<2x1024xf32, #tpu.memory_space<any>> -> memref<2x256xf32, #tpu.memory_space<any>>
    %c0_i32_53 = arith.constant 0 : i32
    %c512_i32_54 = arith.constant 512 : i32
    %41 = tpu.memref_slice %arg2[%c0_i32_53, %c512_i32_54] : memref<2x3072xf32, #tpu.memory_space<any>> -> memref<2x256xf32, #tpu.memory_space<any>>
    %42 = tpu.memref_slice %arg3[%c0_i32_49, %c2_i32_50] : memref<2x4x!tpu.dma_semaphore, #tpu.memory_space<semaphore_mem>> -> memref<1x1x!tpu.dma_semaphore, #tpu.memory_space<semaphore_mem>>
    %43 = tpu.memref_squeeze %42 : memref<1x1x!tpu.dma_semaphore, #tpu.memory_space<semaphore_mem>> -> memref<!tpu.dma_semaphore, #tpu.memory_space<semaphore_mem>>
    tpu.wait_dma2 semaphore(%43 : memref<!tpu.dma_semaphore, #tpu.memory_space<semaphore_mem>>) src(%40 : memref<2x256xf32, #tpu.memory_space<any>>) dst(%41 : memref<2x256xf32, #tpu.memory_space<any>>)
    %c0_i32_55 = arith.constant 0 : i32
    %c3_i32_56 = arith.constant 3 : i32
    %c0_i32_57 = arith.constant 0 : i32
    %c768_i32_58 = arith.constant 768 : i32
    %44 = tpu.memref_slice %arg0[%c0_i32_57, %c768_i32_58] : memref<2x1024xf32, #tpu.memory_space<any>> -> memref<2x256xf32, #tpu.memory_space<any>>
    %c0_i32_59 = arith.constant 0 : i32
    %c768_i32_60 = arith.constant 768 : i32
    %45 = tpu.memref_slice %arg2[%c0_i32_59, %c768_i32_60] : memref<2x3072xf32, #tpu.memory_space<any>> -> memref<2x256xf32, #tpu.memory_space<any>>
    %46 = tpu.memref_slice %arg3[%c0_i32_55, %c3_i32_56] : memref<2x4x!tpu.dma_semaphore, #tpu.memory_space<semaphore_mem>> -> memref<1x1x!tpu.dma_semaphore, #tpu.memory_space<semaphore_mem>>
    %47 = tpu.memref_squeeze %46 : memref<1x1x!tpu.dma_semaphore, #tpu.memory_space<semaphore_mem>> -> memref<!tpu.dma_semaphore, #tpu.memory_space<semaphore_mem>>
    tpu.wait_dma2 semaphore(%47 : memref<!tpu.dma_semaphore, #tpu.memory_space<semaphore_mem>>) src(%44 : memref<2x256xf32, #tpu.memory_space<any>>) dst(%45 : memref<2x256xf32, #tpu.memory_space<any>>)
    %c1_i32_61 = arith.constant 1 : i32
    %c0_i32_62 = arith.constant 0 : i32
    %c0_i32_63 = arith.constant 0 : i32
    %c0_i32_64 = arith.constant 0 : i32
    %48 = tpu.memref_slice %arg1[%c0_i32_63, %c0_i32_64] : memref<2x2048xf32, #tpu.memory_space<any>> -> memref<2x512xf32, #tpu.memory_space<any>>
    %c0_i32_65 = arith.constant 0 : i32
    %c1024_i32_66 = arith.constant 1024 : i32
    %49 = tpu.memref_slice %arg2[%c0_i32_65, %c1024_i32_66] : memref<2x3072xf32, #tpu.memory_space<any>> -> memref<2x512xf32, #tpu.memory_space<any>>
    %50 = tpu.memref_slice %arg3[%c1_i32_61, %c0_i32_62] : memref<2x4x!tpu.dma_semaphore, #tpu.memory_space<semaphore_mem>> -> memref<1x1x!tpu.dma_semaphore, #tpu.memory_space<semaphore_mem>>
    %51 = tpu.memref_squeeze %50 : memref<1x1x!tpu.dma_semaphore, #tpu.memory_space<semaphore_mem>> -> memref<!tpu.dma_semaphore, #tpu.memory_space<semaphore_mem>>
    tpu.wait_dma2 semaphore(%51 : memref<!tpu.dma_semaphore, #tpu.memory_space<semaphore_mem>>) src(%48 : memref<2x512xf32, #tpu.memory_space<any>>) dst(%49 : memref<2x512xf32, #tpu.memory_space<any>>)
    %c1_i32_67 = arith.constant 1 : i32
    %c1_i32_68 = arith.constant 1 : i32
    %c0_i32_69 = arith.constant 0 : i32
    %c512_i32_70 = arith.constant 512 : i32
    %52 = tpu.memref_slice %arg1[%c0_i32_69, %c512_i32_70] : memref<2x2048xf32, #tpu.memory_space<any>> -> memref<2x512xf32, #tpu.memory_space<any>>
    %c0_i32_71 = arith.constant 0 : i32
    %c1536_i32_72 = arith.constant 1536 : i32
    %53 = tpu.memref_slice %arg2[%c0_i32_71, %c1536_i32_72] : memref<2x3072xf32, #tpu.memory_space<any>> -> memref<2x512xf32, #tpu.memory_space<any>>
    %54 = tpu.memref_slice %arg3[%c1_i32_67, %c1_i32_68] : memref<2x4x!tpu.dma_semaphore, #tpu.memory_space<semaphore_mem>> -> memref<1x1x!tpu.dma_semaphore, #tpu.memory_space<semaphore_mem>>
    %55 = tpu.memref_squeeze %54 : memref<1x1x!tpu.dma_semaphore, #tpu.memory_space<semaphore_mem>> -> memref<!tpu.dma_semaphore, #tpu.memory_space<semaphore_mem>>
    tpu.wait_dma2 semaphore(%55 : memref<!tpu.dma_semaphore, #tpu.memory_space<semaphore_mem>>) src(%52 : memref<2x512xf32, #tpu.memory_space<any>>) dst(%53 : memref<2x512xf32, #tpu.memory_space<any>>)
    %c1_i32_73 = arith.constant 1 : i32
    %c2_i32_74 = arith.constant 2 : i32
    %c0_i32_75 = arith.constant 0 : i32
    %c1024_i32_76 = arith.constant 1024 : i32
    %56 = tpu.memref_slice %arg1[%c0_i32_75, %c1024_i32_76] : memref<2x2048xf32, #tpu.memory_space<any>> -> memref<2x512xf32, #tpu.memory_space<any>>
    %c0_i32_77 = arith.constant 0 : i32
    %c2048_i32_78 = arith.constant 2048 : i32
    %57 = tpu.memref_slice %arg2[%c0_i32_77, %c2048_i32_78] : memref<2x3072xf32, #tpu.memory_space<any>> -> memref<2x512xf32, #tpu.memory_space<any>>
    %58 = tpu.memref_slice %arg3[%c1_i32_73, %c2_i32_74] : memref<2x4x!tpu.dma_semaphore, #tpu.memory_space<semaphore_mem>> -> memref<1x1x!tpu.dma_semaphore, #tpu.memory_space<semaphore_mem>>
    %59 = tpu.memref_squeeze %58 : memref<1x1x!tpu.dma_semaphore, #tpu.memory_space<semaphore_mem>> -> memref<!tpu.dma_semaphore, #tpu.memory_space<semaphore_mem>>
    tpu.wait_dma2 semaphore(%59 : memref<!tpu.dma_semaphore, #tpu.memory_space<semaphore_mem>>) src(%56 : memref<2x512xf32, #tpu.memory_space<any>>) dst(%57 : memref<2x512xf32, #tpu.memory_space<any>>)
    %c1_i32_79 = arith.constant 1 : i32
    %c3_i32_80 = arith.constant 3 : i32
    %c0_i32_81 = arith.constant 0 : i32
    %c1536_i32_82 = arith.constant 1536 : i32
    %60 = tpu.memref_slice %arg1[%c0_i32_81, %c1536_i32_82] : memref<2x2048xf32, #tpu.memory_space<any>> -> memref<2x512xf32, #tpu.memory_space<any>>
    %c0_i32_83 = arith.constant 0 : i32
    %c2560_i32_84 = arith.constant 2560 : i32
    %61 = tpu.memref_slice %arg2[%c0_i32_83, %c2560_i32_84] : memref<2x3072xf32, #tpu.memory_space<any>> -> memref<2x512xf32, #tpu.memory_space<any>>
    %62 = tpu.memref_slice %arg3[%c1_i32_79, %c3_i32_80] : memref<2x4x!tpu.dma_semaphore, #tpu.memory_space<semaphore_mem>> -> memref<1x1x!tpu.dma_semaphore, #tpu.memory_space<semaphore_mem>>
    %63 = tpu.memref_squeeze %62 : memref<1x1x!tpu.dma_semaphore, #tpu.memory_space<semaphore_mem>> -> memref<!tpu.dma_semaphore, #tpu.memory_space<semaphore_mem>>
    tpu.wait_dma2 semaphore(%63 : memref<!tpu.dma_semaphore, #tpu.memory_space<semaphore_mem>>) src(%60 : memref<2x512xf32, #tpu.memory_space<any>>) dst(%61 : memref<2x512xf32, #tpu.memory_space<any>>)
    return
  }
}

</mosaic_0001>

<bundles_post_ra>
// kernel: tpu_custom_call.1
= control target key start
LH: loop header
LB: loop body
LE: loop exit
PB: predicated region body
PF: predicated region fallthrough
CT: control target
= control target key end

     0   :  { %s230_s18 = smov [#allocation2]   ;;  %s231_s19 = smov [#allocation3]   ;;  %s318_s0 = inlined_call_operand.hbm [shape: f32[2,1024], index: 0, kind: input, shape index: {}]   ;;  %s319_s2 = inlined_call_operand.hbm [shape: f32[2,3072], index: 2, kind: output, shape index: {}]   ;;  %s320_s1 = inlined_call_operand.hbm [shape: f32[2,2048], index: 1, kind: input, shape index: {}]  }
   0x1   :  { %s11_s11 = sshll.u32 %s318_s0, 4  ;;  %s13_s14 = sshll.u32 %s319_s2, 4  ;;  %s12_s11 = int_to_ptr.hbm [resolvable:$true] %s11_s11  ;;  %s14_s14 = int_to_ptr.hbm [resolvable:$true] %s13_s14 }
   0x2   :  { %s18_s17 = scalar_lea.hbm %s318_s0, 4  ;;  %s232_s20 = smov 0  }
   0x3   :  { %17 = dma.general %s12_s11, 64, %s14_s14, %s230_s18, %s231_s19, [#allocation4], %s232_s20, 0  }
   0x4   :  { %s19_s23 = scalar_lea.hbm %s319_s2, 4  ;;  %s25_s24 = sshll.u32 %s18_s17, 4  ;;  %s26_s24 = int_to_ptr.hbm [resolvable:$true] %s25_s24 }
   0x5   :  { %s27_s25 = sshll.u32 %s19_s23, 4  ;;  %s32_s28 = scalar_lea.hbm %s318_s0, 8  ;;  %s28_s25 = int_to_ptr.hbm [resolvable:$true] %s27_s25 }
   0x6   :  { %s233_s29 = smov [#allocation2 + $0x1]   ;;  %s234_s30 = smov [#allocation5]  }
   0x7   :  { %31 = dma.general %s26_s24, 64, %s28_s25, %s233_s29, %s234_s30, [#allocation6], %s232_s20, 0  }
   0x8   :  { %s33_s5 = scalar_lea.hbm %s319_s2, 8  ;;  %s39_s6 = sshll.u32 %s32_s28, 4  ;;  %s40_s6 = int_to_ptr.hbm [resolvable:$true] %s39_s6 }
   0x9   :  { %s41_s7 = sshll.u32 %s33_s5, 4  ;;  %s46_s10 = scalar_lea.hbm %s318_s0, 12  ;;  %s42_s7 = int_to_ptr.hbm [resolvable:$true] %s41_s7 }
   0xa   :  { %s235_s11 = smov [#allocation2 + $0x2]   ;;  %s236_s12 = smov [#allocation7]  }
   0xb   :  { %45 = dma.general %s40_s6, 64, %s42_s7, %s235_s11, %s236_s12, [#allocation8], %s232_s20, 0  }
   0xc   :  { %s47_s15 = scalar_lea.hbm %s319_s2, 12  ;;  %s53_s16 = sshll.u32 %s46_s10, 4  ;;  %s54_s16 = int_to_ptr.hbm [resolvable:$true] %s53_s16 }
   0xd   :  { %s55_s17 = sshll.u32 %s47_s15, 4  ;;  %s60_s21 = scalar_lea.hbm %s319_s2, 16  ;;  %s56_s17 = int_to_ptr.hbm [resolvable:$true] %s55_s17 }
   0xe   :  { %s237_s22 = smov [#allocation2 + $0x3]   ;;  %s238_s23 = smov [#allocation9]  }
   0xf   :  { %59 = dma.general %s54_s16, 64, %s56_s17, %s237_s22, %s238_s23, [#allocation10], %s232_s20, 0  }
  0x10   :  { %s66_s25 = sshll.u32 %s320_s1, 4  ;;  %s68_s26 = sshll.u32 %s60_s21, 4  ;;  %s67_s25 = int_to_ptr.hbm [resolvable:$true] %s66_s25  ;;  %s69_s26 = int_to_ptr.hbm [resolvable:$true] %s68_s26 }
  0x11   :  { %s239_s27 = smov [#allocation2 + $0x4]   ;;  %s240_s28 = smov [#allocation11]  }
  0x12   :  { %72 = dma.general %s67_s25, 128, %s69_s26, %s239_s27, %s240_s28, [#allocation12], %s232_s20, 0  }
  0x13   :  { %s73_s3 = scalar_lea.hbm %s320_s1, 8  ;;  %s74_s6 = scalar_lea.hbm %s319_s2, 24 }
  0x14   :  { %s80_s7 = sshll.u32 %s73_s3, 4  ;;  %s82_s8 = sshll.u32 %s74_s6, 4  ;;  %s81_s7 = int_to_ptr.hbm [resolvable:$true] %s80_s7  ;;  %s83_s8 = int_to_ptr.hbm [resolvable:$true] %s82_s8 }
  0x15   :  { %s241_s9 = smov [#allocation2 + $0x5]   ;;  %s242_s10 = smov [#allocation13]  }
  0x16   :  { %86 = dma.general %s81_s7, 128, %s83_s8, %s241_s9, %s242_s10, [#allocation14], %s232_s20, 0  }
  0x17   :  { %s87_s13 = scalar_lea.hbm %s320_s1, 16  ;;  %s88_s16 = scalar_lea.hbm %s319_s2, 32 }
  0x18   :  { %s94_s17 = sshll.u32 %s87_s13, 4  ;;  %s96_s18 = sshll.u32 %s88_s16, 4  ;;  %s95_s17 = int_to_ptr.hbm [resolvable:$true] %s94_s17  ;;  %s97_s18 = int_to_ptr.hbm [resolvable:$true] %s96_s18 }
  0x19   :  { %s243_s19 = smov [#allocation2 + $0x6]   ;;  %s244_s21 = smov [#allocation15]  }
  0x1a   :  { %100 = dma.general %s95_s17, 128, %s97_s18, %s243_s19, %s244_s21, [#allocation16], %s232_s20, 0  }
  0x1b   :  { %s101_s0 = scalar_lea.hbm %s320_s1, 24  ;;  %s102_s26 = scalar_lea.hbm %s319_s2, 40 }
  0x1c   :  { %s108_s27 = sshll.u32 %s101_s0, 4  ;;  %s110_s28 = sshll.u32 %s102_s26, 4  ;;  %s109_s27 = int_to_ptr.hbm [resolvable:$true] %s108_s27  ;;  %s111_s28 = int_to_ptr.hbm [resolvable:$true] %s110_s28 }
  0x1d   :  { %s245_s29 = smov [#allocation2 + $0x7]   ;;  %s246_s30 = smov [#allocation17]  }
  0x1e   :  { %114 = dma.general %s109_s27, 128, %s111_s28, %s245_s29, %s246_s30, [#allocation18], %s232_s20, 0  }
  0x1f   :  { %214 = dma.done.wait [#allocation2], 64 }
  0x20   :  { %215 = vsyncadd [#allocation2], 4294967232 }
  0x21   :  { %216 = dma.done.wait [#allocation2 + $0x1], 64 }
  0x22   :  { %217 = vsyncadd [#allocation2 + $0x1], 4294967232 }
  0x23   :  { %218 = dma.done.wait [#allocation2 + $0x2], 64 }
  0x24   :  { %219 = vsyncadd [#allocation2 + $0x2], 4294967232 }
  0x25   :  { %220 = dma.done.wait [#allocation2 + $0x3], 64 }
  0x26   :  { %221 = vsyncadd [#allocation2 + $0x3], 4294967232 }
  0x27   :  { %222 = dma.done.wait [#allocation2 + $0x4], 128 }
  0x28   :  { %223 = vsyncadd [#allocation2 + $0x4], 4294967168 }
  0x29   :  { %224 = dma.done.wait [#allocation2 + $0x5], 128 }
  0x2a   :  { %225 = vsyncadd [#allocation2 + $0x5], 4294967168 }
  0x2b   :  { %226 = dma.done.wait [#allocation2 + $0x6], 128 }
  0x2c   :  { %227 = vsyncadd [#allocation2 + $0x6], 4294967168 }
  0x2d   :  { %228 = dma.done.wait [#allocation2 + $0x7], 128 }
  0x2e   :  { %229 = vsyncadd [#allocation2 + $0x7], 4294967168 }
  0x2f   :  { %134 = vsyncmov [#allocation2] }
  0x32   :  { %s135_s1 = vpop.sfrf %134 }
  0x33   :  { %p189_p0 = scmp.ne.s32.totalorder %s135_s1, 0 }
  0x35   :  { %139 = shalt.err (%p189_p0)  }
  0x36   :  { %141 = vsyncmov [#allocation2 + $0x1] }
  0x39   :  { %s142_s2 = vpop.sfrf %141 }
  0x3a   :  { %p190_p1 = scmp.ne.s32.totalorder %s142_s2, 0 }
  0x3c   :  { %146 = shalt.err (%p190_p1)  }
  0x3d   :  { %148 = vsyncmov [#allocation2 + $0x2] }
  0x40   :  { %s149_s20 = vpop.sfrf %148 }
  0x41   :  { %p191_p2 = scmp.ne.s32.totalorder %s149_s20, 0 }
  0x43   :  { %153 = shalt.err (%p191_p2)  }
  0x44   :  { %155 = vsyncmov [#allocation2 + $0x3] }
  0x47   :  { %s156_s3 = vpop.sfrf %155 }
  0x48   :  { %p192_p3 = scmp.ne.s32.totalorder %s156_s3, 0 }
  0x4a   :  { %160 = shalt.err (%p192_p3)  }
  0x4b   :  { %162 = vsyncmov [#allocation2 + $0x4] }
  0x4e   :  { %s163_s4 = vpop.sfrf %162 }
  0x4f   :  { %p193_p4 = scmp.ne.s32.totalorder %s163_s4, 0 }
  0x51   :  { %167 = shalt.err (%p193_p4)  }
  0x52   :  { %169 = vsyncmov [#allocation2 + $0x5] }
  0x55   :  { %s170_s5 = vpop.sfrf %169 }
  0x56   :  { %p194_p5 = scmp.ne.s32.totalorder %s170_s5, 0 }
  0x58   :  { %174 = shalt.err (%p194_p5)  }
  0x59   :  { %176 = vsyncmov [#allocation2 + $0x6] }
  0x5c   :  { %s177_s6 = vpop.sfrf %176 }
  0x5d   :  { %p195_p6 = scmp.ne.s32.totalorder %s177_s6, 0 }
  0x5f   :  { %181 = shalt.err (%p195_p6)  }
  0x60   :  { %183 = vsyncmov [#allocation2 + $0x7] }
  0x63   :  { %s184_s7 = vpop.sfrf %183 }
  0x64   :  { %p196_p7 = scmp.ne.s32.totalorder %s184_s7, 0 }
  0x66   :  { %188 = shalt.err (%p196_p7)  }

</bundles_post_ra>
